<compile_context>
chip_gen: v7x
topology: tpu7x:2x2x1
jax: 0.10.0
libtpu: 0.0.40
codegen_flags: <defaults>
</compile_context>

<pallas_src>
import functools

import numpy as np
import jax
import jax.numpy as jnp
from jax.experimental import pallas as pl
from jax.experimental.pallas import tpu as pltpu


def _round_up(n: int, m: int) -> int:
    return ((n + m - 1) // m) * m


def _interp_weight_matrix(l_in: int, l_out: int, dtype=jnp.float32):
    """W[i, j] = contribution of x[..., i] to y[..., j] for linear interpolation
    with align_corners=True (matches F.interpolate(mode='linear',
    align_corners=True))."""
    if l_in == l_out:
        return jnp.eye(l_in, dtype=dtype)
    if l_in == 1:
        return jnp.ones((1, l_out), dtype)
    if l_out == 1:
        w = np.zeros((l_in, 1), np.float32)
        w[0, 0] = 1.0
        return jnp.asarray(w, dtype)
    coord = np.arange(l_out, dtype=np.float64) * (l_in - 1) / (l_out - 1)
    i0 = np.clip(np.floor(coord).astype(np.int64), 0, l_in - 1)
    i1 = np.minimum(i0 + 1, l_in - 1)
    frac = (coord - i0).astype(np.float32)
    cols = np.arange(l_out)
    w = np.zeros((l_in, l_out), np.float32)
    w[i0, cols] += (1.0 - frac)
    w[i1, cols] += frac
    return jnp.asarray(w, dtype)


def _gate_add_norm_kernel(x_ref, skip_ref, wv_ref, wg_ref, bv_ref, bg_ref,
                          gamma_ref, beta_ref, *rest, eps):
    # rest == (wskip_ref, o_ref) when the skip needs resampling, else (o_ref,)
    if len(rest) == 2:
        wskip_ref, o_ref = rest
        skip_r = jnp.dot(skip_ref[...], wskip_ref[...],
                         preferred_element_type=jnp.float32)      # (TM, H)
    else:
        (o_ref,) = rest
        skip_r = skip_ref[...].astype(jnp.float32)                # (TM, H)

    # --- gatedLinearUnit: two half-width matmuls (no lane-dim slicing) ----
    x = x_ref[...]
    h_val = jnp.dot(x, wv_ref[...], preferred_element_type=jnp.float32)
    h_val = h_val + bv_ref[...]
    h_gate = jnp.dot(x, wg_ref[...], preferred_element_type=jnp.float32)
    h_gate = h_gate + bg_ref[...]
    glu = h_val * jax.nn.sigmoid(h_gate)                          # (TM, H)

    # --- addNorm: residual add + LayerNorm (biased variance) -------------
    s = glu + skip_r
    mean = jnp.mean(s, axis=-1, keepdims=True)
    cent = s - mean
    var = jnp.mean(cent * cent, axis=-1, keepdims=True)
    x_hat = cent * jax.lax.rsqrt(var + eps)
    o_ref[...] = (x_hat * gamma_ref[...] + beta_ref[...]).astype(o_ref.dtype)


def gate_add_norm(x, skip, w_fc, b_fc, gamma, beta, *,
                  eps: float = 1e-5, block_rows: int | None = None):
    """JAX/Pallas equivalent of gateAddNorm.forward (inference path).

    x:    (..., inputSize)
    skip: (..., skipSize)
    w_fc: (inputSize, 2*hiddenSize), b_fc: (2*hiddenSize,)
    gamma/beta: (hiddenSize,) LayerNorm affine params
    """
    d_in = x.shape[-1]
    two_h = w_fc.shape[-1]
    hidden = two_h // 2
    skip_size = skip.shape[-1]
    lead = x.shape[:-1]

    x2d = x.reshape(-1, d_in)
    skip2d = skip.reshape(-1, skip_size)
    n = x2d.shape[0]

    resample = (skip_size != hidden)

    # One-time wrapper-side weight prep (tiny; outside the streamed loop).
    w_val = w_fc[:, :hidden]
    w_gate = w_fc[:, hidden:]
    b_val = b_fc[:hidden].reshape(1, hidden)
    b_gate = b_fc[hidden:].reshape(1, hidden)
    gamma2 = gamma.reshape(1, hidden)
    beta2 = beta.reshape(1, hidden)
    w_skip = _interp_weight_matrix(skip_size, hidden, dtype=x.dtype) if resample else None

    # ---- row-tile sizing against a conservative VMEM budget ---------------
    itemsize = jnp.dtype(x2d.dtype).itemsize
    weight_bytes = 2 * (d_in * two_h
                        + (skip_size * hidden if resample else 0)
                        + 4 * hidden) * itemsize           # resident, double-buffered
    per_row_bytes = (2 * (d_in + skip_size + hidden) * itemsize   # streamed, 2x buffered
                     + 6 * hidden * 4)                            # f32 intermediates
    if block_rows is None:
        budget = 20 * 1024 * 1024          # safe for v5e/v6e (128 MiB) and v7x (64 MiB)
        tm = (budget - weight_bytes) // per_row_bytes
        tm = max(1024, min((int(tm) // 8) * 8, 16384))
    else:
        tm = _round_up(block_rows, 8)
    tm = min(tm, _round_up(n, 8))
    grid = (pl.cdiv(n, tm),)               # ragged last block handled by Pallas

    est_vmem = weight_bytes + tm * per_row_bytes
    vmem_limit = int(min(max(int(est_vmem * 1.75), 24 << 20), 60 << 20))

    cost = pl.CostEstimate(
        flops=2 * n * (d_in * two_h + (skip_size * hidden if resample else 0))
              + 10 * n * hidden,
        transcendentals=n * hidden,
        bytes_accessed=itemsize * (n * (d_in + skip_size + hidden))
                       + itemsize * (d_in * two_h
                                     + (skip_size * hidden if resample else 0)
                                     + 2 * two_h + 2 * hidden),
    )

    row_spec = lambda shape_cols: pl.BlockSpec((tm, shape_cols), lambda i: (i, 0))
    const_spec = lambda r, c: pl.BlockSpec((r, c), lambda i: (0, 0))

    in_specs = [
        row_spec(d_in),                     # x rows: streamed
        row_spec(skip_size),                # skip rows: streamed
        const_spec(d_in, hidden),           # W_fc value half: resident
        const_spec(d_in, hidden),           # W_fc gate half: resident
        const_spec(1, hidden),              # b value half
        const_spec(1, hidden),              # b gate half
        const_spec(1, hidden),              # gamma
        const_spec(1, hidden),              # beta
    ]
    args = [x2d, skip2d, w_val, w_gate, b_val, b_gate, gamma2, beta2]
    if resample:
        in_specs.append(const_spec(skip_size, hidden))   # W_skip: resident
        args.append(w_skip)

    out = pl.pallas_call(
        functools.partial(_gate_add_norm_kernel, eps=eps),
        out_shape=jax.ShapeDtypeStruct((n, hidden), x.dtype),
        grid=grid,
        in_specs=in_specs,
        out_specs=pl.BlockSpec((tm, hidden), lambda i: (i, 0)),
        compiler_params=pltpu.CompilerParams(
            dimension_semantics=("parallel",),   # lets v7x's 2 TCs split the row grid
            vmem_limit_bytes=vmem_limit,
        ),
        cost_estimate=cost,
    )(*args)

    return out.reshape(*lead, hidden)


# ----------------------------- pure-JAX reference -----------------------------

def _interp_ref(x, out_size: int):
    l_in = x.shape[-1]
    if l_in == out_size:
        return x
    if l_in == 1:
        return jnp.broadcast_to(x[..., :1], x.shape[:-1] + (out_size,))
    if out_size == 1:
        return x[..., :1]
    coord = jnp.arange(out_size, dtype=jnp.float32) * (l_in - 1) / (out_size - 1)
    i0 = jnp.clip(jnp.floor(coord).astype(jnp.int32), 0, l_in - 1)
    i1 = jnp.minimum(i0 + 1, l_in - 1)
    frac = coord - i0.astype(jnp.float32)
    x0 = jnp.take(x, i0, axis=-1)
    x1 = jnp.take(x, i1, axis=-1)
    return x0 * (1.0 - frac) + x1 * frac


def _reference(x, skip, w_fc, b_fc, gamma, beta, eps: float = 1e-5):
    hidden = w_fc.shape[-1] // 2
    h = x @ w_fc + b_fc
    glu = h[..., :hidden] * jax.nn.sigmoid(h[..., hidden:])
    if skip.shape[-1] != hidden:
        skip = _interp_ref(skip, hidden)
    s = glu + skip
    mean = jnp.mean(s, axis=-1, keepdims=True)
    var = jnp.mean((s - mean) ** 2, axis=-1, keepdims=True)
    return (s - mean) / jnp.sqrt(var + eps) * gamma + beta


# ------------------------------------ test ------------------------------------

if __name__ == "__main__":
    key = jax.random.PRNGKey(0)
    ks = jax.random.split(key, 6)

    B, T = 2, 8
    INPUT_SIZE, HIDDEN_SIZE, SKIP_SIZE = 32, 32, 16

    x = jax.random.normal(ks[0], (B, T, INPUT_SIZE), jnp.float32)
    skip = jax.random.normal(ks[1], (B, T, SKIP_SIZE), jnp.float32)

    # module init: xavier_uniform fc weight, zero bias; LayerNorm defaults.
    limit = float(np.sqrt(6.0 / (INPUT_SIZE + 2 * HIDDEN_SIZE)))
    w_fc = jax.random.uniform(ks[2], (INPUT_SIZE, 2 * HIDDEN_SIZE),
                              jnp.float32, -limit, limit)
    b_fc = jnp.zeros((2 * HIDDEN_SIZE,), jnp.float32)
    gamma = jnp.ones((HIDDEN_SIZE,), jnp.float32)
    beta = jnp.zeros((HIDDEN_SIZE,), jnp.float32)

    # 1) small case (skipSize != hiddenSize -> interpolation path)
    y = jax.block_until_ready(gate_add_norm(x, skip, w_fc, b_fc, gamma, beta))
    assert y.shape == (B, T, HIDDEN_SIZE), y.shape
    y_ref = _reference(x, skip, w_fc, b_fc, gamma, beta)
    assert jnp.allclose(y, y_ref, atol=1e-4, rtol=1e-4), "small-case mismatch"

    # 2) larger ragged row count -> multi-step row grid + ragged last block
    B2, T2 = 4, 1000  # 4000 rows, not a multiple of the 1024-row tile
    x2 = jax.random.normal(ks[3], (B2, T2, INPUT_SIZE), jnp.float32)
    skip2 = jax.random.normal(ks[4], (B2, T2, SKIP_SIZE), jnp.float32)
    y2 = jax.block_until_ready(
        gate_add_norm(x2, skip2, w_fc, b_fc, gamma, beta, block_rows=1024))
    assert y2.shape == (B2, T2, HIDDEN_SIZE), y2.shape
    y2_ref = _reference(x2, skip2, w_fc, b_fc, gamma, beta)
    assert jnp.allclose(y2, y2_ref, atol=1e-4, rtol=1e-4), "tiled-case mismatch"

    # 3) skipSize == hiddenSize -> direct residual add (no resample matmul)
    skip3 = jax.random.normal(ks[5], (B, T, HIDDEN_SIZE), jnp.float32)
    y3 = jax.block_until_ready(gate_add_norm(x, skip3, w_fc, b_fc, gamma, beta))
    y3_ref = _reference(x, skip3, w_fc, b_fc, gamma, beta)
    assert jnp.allclose(y3, y3_ref, atol=1e-4, rtol=1e-4), "equal-size mismatch"

    # 4) default adaptive tile on a larger input (auto tm, ragged grid)
    B4, T4 = 8, 3000
    x4 = jax.random.normal(ks[3], (B4, T4, INPUT_SIZE), jnp.float32)
    skip4 = jax.random.normal(ks[4], (B4, T4, SKIP_SIZE), jnp.float32)
    y4 = jax.block_until_ready(gate_add_norm(x4, skip4, w_fc, b_fc, gamma, beta))
    y4_ref = _reference(x4, skip4, w_fc, b_fc, gamma, beta)
    assert jnp.allclose(y4, y4_ref, atol=1e-4, rtol=1e-4), "large-case mismatch"

    print("KERNEL_OK")
</pallas_src>

<mosaic_0001>
module attributes {stable_mosaic.version = 11 : i64} {
  func.func @_gate_add_norm_kernel(%arg0: i32, %arg1: memref<16x32xf32, #tpu.memory_space<vmem>>, %arg2: memref<16x16xf32, #tpu.memory_space<vmem>>, %arg3: memref<32x32xf32, #tpu.memory_space<vmem>>, %arg4: memref<32x32xf32, #tpu.memory_space<vmem>>, %arg5: memref<1x32xf32, #tpu.memory_space<vmem>>, %arg6: memref<1x32xf32, #tpu.memory_space<vmem>>, %arg7: memref<1x32xf32, #tpu.memory_space<vmem>>, %arg8: memref<1x32xf32, #tpu.memory_space<vmem>>, %arg9: memref<16x32xf32, #tpu.memory_space<vmem>>, %arg10: memref<16x32xf32, #tpu.memory_space<vmem>>) attributes {dimension_semantics = [#tpu.dimension_semantics<parallel>], iteration_bounds = array<i64: 1>, scalar_prefetch = 0 : i64, scratch_operands = 0 : i64, tpu.core_type = #tpu.core_type<tc>, window_params = [{transform_indices = @transform_0, window_bounds = array<i64: 16, 32>}, {transform_indices = @transform_1, window_bounds = array<i64: 16, 16>}, {pipeline_mode = #tpu.pipeline_mode<synchronous>, transform_indices = @transform_2, window_bounds = array<i64: 32, 32>}, {pipeline_mode = #tpu.pipeline_mode<synchronous>, transform_indices = @transform_3, window_bounds = array<i64: 32, 32>}, {pipeline_mode = #tpu.pipeline_mode<synchronous>, transform_indices = @transform_4, window_bounds = array<i64: 1, 32>}, {pipeline_mode = #tpu.pipeline_mode<synchronous>, transform_indices = @transform_5, window_bounds = array<i64: 1, 32>}, {pipeline_mode = #tpu.pipeline_mode<synchronous>, transform_indices = @transform_6, window_bounds = array<i64: 1, 32>}, {pipeline_mode = #tpu.pipeline_mode<synchronous>, transform_indices = @transform_7, window_bounds = array<i64: 1, 32>}, {pipeline_mode = #tpu.pipeline_mode<synchronous>, transform_indices = @transform_8, window_bounds = array<i64: 16, 32>}, {transform_indices = @transform_9, window_bounds = array<i64: 16, 32>}]} {
    %c0 = arith.constant 0 : index
    %c0_0 = arith.constant 0 : index
    %0 = vector.load %arg2[%c0, %c0_0] : memref<16x16xf32, #tpu.memory_space<vmem>>, vector<16x16xf32>
    %c0_1 = arith.constant 0 : index
    %c0_2 = arith.constant 0 : index
    %1 = vector.load %arg9[%c0_1, %c0_2] : memref<16x32xf32, #tpu.memory_space<vmem>>, vector<16x32xf32>
    %cst = arith.constant dense<0.000000e+00> : vector<16x32xf32>
    %2 = tpu.matmul %0, %1, %cst {dimension_numbers = #tpu.dot_dimension_numbers<[1], [0], [0], [1], [0, 0, 1, 1], [], []>} : vector<16x16xf32>, vector<16x32xf32>, vector<16x32xf32> -> vector<16x32xf32>
    %c0_3 = arith.constant 0 : index
    %c0_4 = arith.constant 0 : index
    %3 = vector.load %arg1[%c0_3, %c0_4] : memref<16x32xf32, #tpu.memory_space<vmem>>, vector<16x32xf32>
    %c0_5 = arith.constant 0 : index
    %c0_6 = arith.constant 0 : index
    %4 = vector.load %arg3[%c0_5, %c0_6] : memref<32x32xf32, #tpu.memory_space<vmem>>, vector<32x32xf32>
    %cst_7 = arith.constant dense<0.000000e+00> : vector<16x32xf32>
    %5 = tpu.matmul %3, %4, %cst_7 {dimension_numbers = #tpu.dot_dimension_numbers<[1], [0], [0], [1], [0, 0, 1, 1], [], []>} : vector<16x32xf32>, vector<32x32xf32>, vector<16x32xf32> -> vector<16x32xf32>
    %c0_8 = arith.constant 0 : index
    %c0_9 = arith.constant 0 : index
    %6 = vector.load %arg5[%c0_8, %c0_9] : memref<1x32xf32, #tpu.memory_space<vmem>>, vector<1x32xf32>
    %7 = vector.broadcast %6 : vector<1x32xf32> to vector<16x32xf32>
    %8 = arith.addf %5, %7 : vector<16x32xf32>
    %c0_10 = arith.constant 0 : index
    %c0_11 = arith.constant 0 : index
    %9 = vector.load %arg4[%c0_10, %c0_11] : memref<32x32xf32, #tpu.memory_space<vmem>>, vector<32x32xf32>
    %cst_12 = arith.constant dense<0.000000e+00> : vector<16x32xf32>
    %10 = tpu.matmul %3, %9, %cst_12 {dimension_numbers = #tpu.dot_dimension_numbers<[1], [0], [0], [1], [0, 0, 1, 1], [], []>} : vector<16x32xf32>, vector<32x32xf32>, vector<16x32xf32> -> vector<16x32xf32>
    %c0_13 = arith.constant 0 : index
    %c0_14 = arith.constant 0 : index
    %11 = vector.load %arg6[%c0_13, %c0_14] : memref<1x32xf32, #tpu.memory_space<vmem>>, vector<1x32xf32>
    %12 = vector.broadcast %11 : vector<1x32xf32> to vector<16x32xf32>
    %13 = arith.addf %10, %12 : vector<16x32xf32>
    %14 = arith.negf %13 : vector<16x32xf32>
    %15 = math.exp %14 : vector<16x32xf32>
    %cst_15 = arith.constant 1.000000e+00 : f32
    %16 = vector.broadcast %cst_15 : f32 to vector<16x32xf32>
    %17 = arith.addf %16, %15 : vector<16x32xf32>
    %18 = arith.divf %16, %17 : vector<16x32xf32>
    %19 = arith.mulf %8, %18 : vector<16x32xf32>
    %20 = arith.addf %19, %2 : vector<16x32xf32>
    %cst_16 = arith.constant dense<0.000000e+00> : vector<16xf32>
    %21 = vector.multi_reduction <add>, %20, %cst_16 [1] : vector<16x32xf32> to vector<16xf32>
    %22 = vector.shape_cast %21 : vector<16xf32> to vector<16x1xf32>
    %cst_17 = arith.constant 3.200000e+01 : f32
    %23 = vector.broadcast %cst_17 : f32 to vector<16x1xf32>
    %24 = arith.divf %22, %23 : vector<16x1xf32>
    %25 = vector.broadcast %24 : vector<16x1xf32> to vector<16x32xf32>
    %26 = arith.subf %20, %25 : vector<16x32xf32>
    %27 = arith.mulf %26, %26 : vector<16x32xf32>
    %cst_18 = arith.constant dense<0.000000e+00> : vector<16xf32>
    %28 = vector.multi_reduction <add>, %27, %cst_18 [1] : vector<16x32xf32> to vector<16xf32>
    %29 = vector.shape_cast %28 : vector<16xf32> to vector<16x1xf32>
    %cst_19 = arith.constant 3.200000e+01 : f32
    %30 = vector.broadcast %cst_19 : f32 to vector<16x1xf32>
    %31 = arith.divf %29, %30 : vector<16x1xf32>
    %cst_20 = arith.constant 9.99999974E-6 : f32
    %32 = vector.broadcast %cst_20 : f32 to vector<16x1xf32>
    %33 = arith.addf %31, %32 : vector<16x1xf32>
    %34 = math.rsqrt %33 : vector<16x1xf32>
    %35 = vector.broadcast %34 : vector<16x1xf32> to vector<16x32xf32>
    %36 = arith.mulf %26, %35 : vector<16x32xf32>
    %c0_21 = arith.constant 0 : index
    %c0_22 = arith.constant 0 : index
    %37 = vector.load %arg7[%c0_21, %c0_22] : memref<1x32xf32, #tpu.memory_space<vmem>>, vector<1x32xf32>
    %38 = vector.broadcast %37 : vector<1x32xf32> to vector<16x32xf32>
    %39 = arith.mulf %36, %38 : vector<16x32xf32>
    %c0_23 = arith.constant 0 : index
    %c0_24 = arith.constant 0 : index
    %40 = vector.load %arg8[%c0_23, %c0_24] : memref<1x32xf32, #tpu.memory_space<vmem>>, vector<1x32xf32>
    %41 = vector.broadcast %40 : vector<1x32xf32> to vector<16x32xf32>
    %42 = arith.addf %39, %41 : vector<16x32xf32>
    %c0_25 = arith.constant 0 : index
    %c0_26 = arith.constant 0 : index
    %43 = vector.load %arg10[%c0_25, %c0_26] : memref<16x32xf32, #tpu.memory_space<vmem>>, vector<16x32xf32>
    tpu.vector_store %arg10[%c0_25, %c0_26], %42 {strides = array<i32>} : memref<16x32xf32, #tpu.memory_space<vmem>>, vector<16x32xf32>,
    return
  }
  func.func @transform_0(%arg0: i32) -> (i32, i32) {
    %c0_i32 = arith.constant 0 : i32
    %c0_i32_0 = arith.constant 0 : i32
    return %arg0, %c0_i32 : i32, i32
  }
  func.func @transform_1(%arg0: i32) -> (i32, i32) {
    %c0_i32 = arith.constant 0 : i32
    %c0_i32_0 = arith.constant 0 : i32
    return %arg0, %c0_i32 : i32, i32
  }
  func.func @transform_2(%arg0: i32) -> (i32, i32) {
    %c0_i32 = arith.constant 0 : i32
    %c0_i32_0 = arith.constant 0 : i32
    %c0_i32_1 = arith.constant 0 : i32
    return %c0_i32, %c0_i32_0 : i32, i32
  }
  func.func @transform_3(%arg0: i32) -> (i32, i32) {
    %c0_i32 = arith.constant 0 : i32
    %c0_i32_0 = arith.constant 0 : i32
    %c0_i32_1 = arith.constant 0 : i32
    return %c0_i32, %c0_i32_0 : i32, i32
  }
  func.func @transform_4(%arg0: i32) -> (i32, i32) {
    %c0_i32 = arith.constant 0 : i32
    %c0_i32_0 = arith.constant 0 : i32
    %c0_i32_1 = arith.constant 0 : i32
    return %c0_i32, %c0_i32_0 : i32, i32
  }
  func.func @transform_5(%arg0: i32) -> (i32, i32) {
    %c0_i32 = arith.constant 0 : i32
    %c0_i32_0 = arith.constant 0 : i32
    %c0_i32_1 = arith.constant 0 : i32
    return %c0_i32, %c0_i32_0 : i32, i32
  }
  func.func @transform_6(%arg0: i32) -> (i32, i32) {
    %c0_i32 = arith.constant 0 : i32
    %c0_i32_0 = arith.constant 0 : i32
    %c0_i32_1 = arith.constant 0 : i32
    return %c0_i32, %c0_i32_0 : i32, i32
  }
  func.func @transform_7(%arg0: i32) -> (i32, i32) {
    %c0_i32 = arith.constant 0 : i32
    %c0_i32_0 = arith.constant 0 : i32
    %c0_i32_1 = arith.constant 0 : i32
    return %c0_i32, %c0_i32_0 : i32, i32
  }
  func.func @transform_8(%arg0: i32) -> (i32, i32) {
    %c0_i32 = arith.constant 0 : i32
    %c0_i32_0 = arith.constant 0 : i32
    %c0_i32_1 = arith.constant 0 : i32
    return %c0_i32, %c0_i32_0 : i32, i32
  }
  func.func @transform_9(%arg0: i32) -> (i32, i32) {
    %c0_i32 = arith.constant 0 : i32
    %c0_i32_0 = arith.constant 0 : i32
    return %arg0, %c0_i32 : i32, i32
  }
}

</mosaic_0001>

<bundles_post_ra>
// kernel: tpu_custom_call.1
= control target key start
LH: loop header
LB: loop body
LE: loop exit
PB: predicated region body
PF: predicated region fallthrough
CT: control target
= control target key end

     0   :  { %14 = vsyncpa [#allocation3], 0  ;;  %s827_s0 = inlined_call_operand.hbm [shape: f32[16,32], index: 0, kind: input, shape index: {}]   ;;  %s828_s1 = inlined_call_operand.hbm [shape: f32[16,16], index: 1, kind: input, shape index: {}]   ;;  %s829_s2 = inlined_call_operand.hbm [shape: f32[32,32], index: 2, kind: input, shape index: {}]   ;;  %s830_s3 = inlined_call_operand.hbm [shape: f32[32,32], index: 3, kind: input, shape index: {}]   ;;  %s831_s4 = inlined_call_operand.vmem [shape: f32[1,32], index: 4, kind: input, shape index: {}]   ;;  %s832_s5 = inlined_call_operand.vmem [shape: f32[1,32], index: 5, kind: input, shape index: {}]   ;;  %s833_s6 = inlined_call_operand.vmem [shape: f32[1,32], index: 6, kind: input, shape index: {}]   ;;  %s834_s7 = inlined_call_operand.vmem [shape: f32[1,32], index: 7, kind: input, shape index: {}]   ;;  %s835_s8 = inlined_call_operand.vmem [shape: f32[16,32], index: 8, kind: input, shape index: {}]   ;;  %s836_s9 = inlined_call_operand.hbm [shape: f32[16,32], index: 9, kind: output, shape index: {}]  }
   0x1   :  { %15 = vsyncpa [#allocation6], 0 }
   0x2   :  { %16 = vsyncpa [#allocation9], 0 }
   0x3   :  { %17 = vsyncpa [#allocation4], 0  ;;  %s651_s30 = smov [#allocation5]   ;;  %s652_s11 = smov [#allocation2]  }
   0x4   :  { %s35_s10 = sshll.u32 %s651_s30, 4  ;;  %s23_s12 = sshll.u32 %s652_s11, 4  ;;  %s36_s10 = int_to_ptr.vmem [resolvable:$true] %s35_s10  ;;  %s708_s12 = int_to_ptr.vmem [resolvable:$true] %s23_s12 }
   0x5   :  { %s533_s15 = scalar_lea.hbm %s828_s1, 256 }
   0x6   :  { %p534_p0 = scmp.ne.s32.totalorder %s828_s1, %s533_s15  ;;  %p537_p1 = scmp.lt.u32.totalorder %s533_s15, %s828_s1 }
   0x8   :  { %p539_p2 = pnand %p537_p1, %p534_p0 }
   0xa   :  { %542 = shalt.err (!%p539_p2)
}
   0xb   :  { %s543_s20 = scalar_lea.vmem %s36_s10, 256  ;;  %p548_p4 = scmp.lt.s32.totalorder %s36_s10, %s36_s10 }
   0xc   :  { %p544_p3 = scmp.ne.s32.totalorder %s36_s10, %s543_s20  ;;  %p549_p5 = scmp.lt.s32.totalorder %s543_s20, %s543_s20 }
   0xe   :  { %p550_p6 = por %p549_p5, %p548_p4 }
  0x10   :  { %p551_p7 = pnand %p550_p6, %p544_p3 }
  0x12   :  { %554 = shalt.err (!%p551_p7)
}
  0x13   :  { %s653_s21 = smov 128   ;;  %s654_s22 = smov 8  }
  0x14   :  { %41 = dma.hbm_to_vmem [thread:$0]  %s828_s1, 256, %s36_s10, [#allocation6], %s653_s21, %s653_s21, %s654_s22  }
  0x15   :  { %s555_s27 = scalar_lea.hbm %s827_s0, 256 }
  0x16   :  { %p556_p8 = scmp.ne.s32.totalorder %s827_s0, %s555_s27  ;;  %p559_p9 = scmp.lt.u32.totalorder %s555_s27, %s827_s0 }
  0x18   :  { %p561_p10 = pnand %p559_p9, %p556_p8 }
  0x1a   :  { %564 = shalt.err (!%p561_p10)
}
  0x1b   :  { %s565_s13 = scalar_lea.vmem %s708_s12, 256  ;;  %p570_p12 = scmp.lt.s32.totalorder %s708_s12, %s708_s12 }
  0x1c   :  { %p566_p11 = scmp.ne.s32.totalorder %s708_s12, %s565_s13  ;;  %p571_p13 = scmp.lt.s32.totalorder %s565_s13, %s565_s13 }
  0x1e   :  { %p572_p0 = por %p571_p13, %p570_p12 }
  0x20   :  { %p573_p1 = pnand %p572_p0, %p566_p11 }
  0x22   :  { %576 = shalt.err (!%p573_p1)
}
  0x23   :  { %29 = dma.hbm_to_vmem [thread:$0]  %s827_s0, 256, %s708_s12, [#allocation3], %s653_s21, %s653_s21, %s654_s22  }
  0x24   :  { %s655_s14 = smov [#allocation7]   ;;  %s656_s16 = smov [#allocation8]  }
  0x25   :  { %s47_s15 = sshll.u32 %s655_s14, 4  ;;  %s59_s17 = sshll.u32 %s656_s16, 4  ;;  %s48_s15 = int_to_ptr.vmem [resolvable:$true] %s47_s15  ;;  %s745_s17 = int_to_ptr.vmem [resolvable:$true] %s59_s17 }
  0x26   :  { %s577_s20 = scalar_lea.hbm %s829_s2, 512 }
  0x27   :  { %p578_p2 = scmp.ne.s32.totalorder %s829_s2, %s577_s20  ;;  %p581_p3 = scmp.lt.u32.totalorder %s577_s20, %s829_s2 }
  0x29   :  { %p583_p4 = pnand %p581_p3, %p578_p2 }
  0x2b   :  { %586 = shalt.err (!%p583_p4)
}
  0x2c   :  { %s587_s0 = scalar_lea.vmem %s48_s15, 512  ;;  %p592_p6 = scmp.lt.s32.totalorder %s48_s15, %s48_s15 }
  0x2d   :  { %p588_p5 = scmp.ne.s32.totalorder %s48_s15, %s587_s0  ;;  %p593_p7 = scmp.lt.s32.totalorder %s587_s0, %s587_s0 }
  0x2f   :  { %p594_p8 = por %p593_p7, %p592_p6 }
  0x31   :  { %p595_p9 = pnand %p594_p8, %p588_p5 }
  0x33   :  { %598 = shalt.err (!%p595_p9)
}
  0x34   :  { %53 = dma.hbm_to_vmem [thread:$0]  %s829_s2, 512, %s48_s15, [#allocation6], %s653_s21, %s653_s21, %s654_s22  }
  0x35   :  { %s599_s30 = scalar_lea.hbm %s830_s3, 512 }
  0x36   :  { %p600_p10 = scmp.ne.s32.totalorder %s830_s3, %s599_s30  ;;  %p603_p11 = scmp.lt.u32.totalorder %s599_s30, %s830_s3 }
  0x38   :  { %p605_p12 = pnand %p603_p11, %p600_p10 }
  0x3a   :  { %608 = shalt.err (!%p605_p12)
}
  0x3b   :  { %s609_s14 = scalar_lea.vmem %s745_s17, 512  ;;  %p614_p0 = scmp.lt.s32.totalorder %s745_s17, %s745_s17 }
  0x3c   :  { %p610_p13 = scmp.ne.s32.totalorder %s745_s17, %s609_s14  ;;  %p615_p1 = scmp.lt.s32.totalorder %s609_s14, %s609_s14 }
  0x3e   :  { %p616_p2 = por %p615_p1, %p614_p0 }
  0x40   :  { %p617_p3 = pnand %p616_p2, %p610_p13 }
  0x42   :  { %620 = shalt.err (!%p617_p3)
}
  0x43   :  { %65 = dma.hbm_to_vmem [thread:$0]  %s830_s3, 512, %s745_s17, [#allocation9], %s653_s21, %s653_s21, %s654_s22  }
  0x44   :  { %643 = dma.done.wait [#allocation3], 256  }
  0x45   :  { %644 = vsyncadd [#allocation3], 4294967040 }
  0x46   :  { %645 = dma.done.wait [#allocation6], 768  }
  0x47   :  { %646 = vsyncadd [#allocation6], 4294966528 }
  0x48   :  { %647 = dma.done.wait [#allocation9], 512  }
  0x49   :  { %648 = vsyncadd [#allocation9], 4294966784  ;;  %vm92_vm0 = vcmask 130048   ;;  %v90_v0 = vld [vmem:[%s835_s8] sm:$0xff]  ;;  %v91_v1 = vld [vmem:[%s835_s8 + $0x8] sm:$0xff]  ;;  %vm187_vm1 = vcmask 261120  }
  0x4a   :  { %v88_v2 = vld [vmem:[#allocation5] sm:$0xff]  ;;  %v494_v3 = vpack.c.bf16 %v91_v1, %v90_v0  ;;  %v269_v4 = vld [vmem:[#allocation8] sm:$0xff]  ;;  %v270_v5 = vld [vmem:[#allocation8 + $0x8] sm:$0xff]  ;;  %s657_s26 = smov [#allocation10]  }
  0x4b   :  { %469 = vmatprep.mubr.msk.f32.mxu0 %vm92_vm0, %v88_v2  ;;  %v506_v6 = vpack.c.bf16 %v270_v5, %v269_v4  ;;  %v271_v7 = vld [vmem:[#allocation8 + $0x10] sm:$0xff]  ;;  %v272_v8 = vld [vmem:[#allocation8 + $0x18] sm:$0xff]  ;;  %v174_v9 = vld [vmem:[#allocation2] sm:$0xff]  ;;  %s423_s0 = sshll.u32 %s657_s26, 4  ;;  %s424_s0 = int_to_ptr.vmem [resolvable:$true] %s423_s0 }
  0x4c   :  { %495 = vmatprep.subr.bf16.mxu0 %v494_v3  ;;  %v176_v10 = vld [vmem:[#allocation7] sm:$0xff]  ;;  %v177_v11 = vld [vmem:[#allocation7 + $0x8] sm:$0xff]  ;;  %480 = vmatprep.mubr.msk.f32.mxu1 %vm187_vm1, %v174_v9  ;;  %v89_v12 = vld [vmem:[#allocation5 + $0x8] sm:$0xff]  ;;  %v510_v16 = vpack.c.bf16 %v272_v8, %v271_v7  ;;  %s621_s12 = scalar_lea.vmem %s424_s0, 256  ;;  %p626_p5 = scmp.lt.s32.totalorder %s424_s0, %s424_s0 }
  0x4d   :  { %497 = vmatpush3.bf16.msra.mxu0 %v494_v3  ;;  %v498_v13 = vpack.c.bf16 %v177_v11, %v176_v10  ;;  %v178_v14 = vld [vmem:[#allocation7 + $0x10] sm:$0xff]  ;;  %v179_v15 = vld [vmem:[#allocation7 + $0x18] sm:$0xff]  ;;  %v175_v18 = vld [vmem:[#allocation2 + $0x8] sm:$0xff]  ;;  %p622_p4 = scmp.ne.s32.totalorder %s424_s0, %s621_s12  ;;  %p627_p6 = scmp.lt.s32.totalorder %s621_s12, %s621_s12 }
  0x4e   :  { %507 = vmatprep.subr.bf16.mxu0 %v506_v6  ;;  %v502_v17 = vpack.c.bf16 %v179_v15, %v178_v14  ;;  %v442_v21 = vld [vmem:[%s832_s5] ss:$0 sm:$0xff] }
  0x4f   :  { %499 = vmatprep.subr.bf16.mxu1 %v498_v13  ;;  %v439_v34 = vld [vmem:[%s831_s4] ss:$0 sm:$0xff]  ;;  %p628_p7 = por %p627_p6, %p626_p5 }
  0x50   :  { %470 = vmatmul.mubr.msk.f32.vlgmr.msra.gmra.mrb[0].mxu0 %vm92_vm0, %v89_v12  ;;  %501 = vmatpush3.bf16.msra.mxu1 %v498_v13  ;;  %v447_v62 = vld [vmem:[%s833_s6] ss:$0 sm:$0xff] }
  0x51   :  { %509 = vmatpush3.bf16.msra.mxu0 %v506_v6  ;;  %491 = vmatprep.mubr.msk.f32.mxu0 %vm187_vm1, %v174_v9  ;;  %v448_v0 = vld [vmem:[%s834_s7] ss:$0 sm:$0xff]  ;;  %p629_p8 = pnand %p628_p7, %p622_p4 }
  0x52   :  { %511 = vmatprep.subr.bf16.mxu0 %v510_v16  ;;  %503 = vmatprep.subr.bf16.mxu1 %v502_v17 }
  0x54   :  { %505 = vmatpush3.bf16.msra.mxu1 %v502_v17 }
  0x55   :  { %513 = vmatpush3.bf16.msra.mxu0 %v510_v16 }
  0x57   :  { %481 = vmatmul.mubr.msk.f32.vlgmr.msra.gmra.mrb[0].mxu1 %vm187_vm1, %v175_v18 }
  0x58   :  { %492 = vmatmul.mubr.msk.f32.vlgmr.msra.gmra.mrb[2].mxu0 %vm187_vm1, %v175_v18 }
 0x123   :  { %v471_v19 = vpop.f32.mrb[0].mxu0 }
 0x124   :  { %v165_v20 = vpop.f32.mrb[1].mxu0 }
 0x12a   :  { %v482_v22 = vpop.f32.mrb[0].mxu1 }
 0x12b   :  { %v493_v23 = vpop.f32.mrb[2].mxu0  ;;  %v260_v24 = vpop.f32.mrb[1].mxu1  ;;  %v266_v35 = vadd.f32 %v482_v22, %v439_v34 }
 0x12c   :  { %v352_v25 = vadd.f32 %v493_v23, %v442_v21  ;;  %v346_v26 = vpop.f32.mrb[3].mxu0  ;;  %v261_v36 = vadd.f32 %v439_v34, %v260_v24 }
 0x12d   :  { %v347_v27 = vadd.f32 %v442_v21, %v346_v26 }
 0x12e   :  { %v446_v28 = vmul.f32 -1.442695, %v352_v25 }
 0x12f   :  { %v445_v29 = vmul.f32 -1.442695, %v347_v27 }
 0x130   :  { %521 = vpow2.f32 %v446_v28 }
 0x131   :  { %523 = vpow2.f32 %v445_v29 }
 0x13a   :  { %v522_v30 = vpop.eup %521 }
 0x13b   :  { %v524_v31 = vpop.eup %523  ;;  %v362_v32 = vadd.f32 1.0, %v522_v30 }
 0x13c   :  { %v361_v33 = vadd.f32 1.0, %v524_v31 }
 0x13d   :  { %525 = vrcp.f32 %v362_v32 }
 0x13e   :  { %527 = vrcp.f32 %v361_v33 }
 0x147   :  { %v526_v37 = vpop.eup %525 }
 0x148   :  { %v528_v38 = vpop.eup %527  ;;  %v368_v39 = vmul.f32 %v526_v37, %v266_v35 }
 0x149   :  { %v367_v40 = vmul.f32 %v528_v38, %v261_v36 }
 0x14a   :  { %v370_v41 = vadd.f32 %v471_v19, %v368_v39 }
 0x14b   :  { %v369_v42 = vadd.f32 %v367_v40, %v165_v20 }
 0x14c   :  { %v374_v44 = vsel %vm187_vm1, %v370_v41, 0.0 }
 0x14d   :  { %v371_v43 = vsel %vm187_vm1, %v369_v42, 0.0 }
 0x14e   :  { %372 = vadd.xlane.f32.xlu0 %v371_v43 }
 0x152   :  { %375 = vadd.xlane.f32.xlu0 %v374_v44 }
 0x1db   :  { %v373_v45 = vpop.xlane.xlu0 %372 }
 0x1dc   :  { %v378_v46 = vmul.f32 0.03125, %v373_v45 }
 0x1de   :  { %v380_v47 = vsub.f32 %v369_v42, %v378_v46 }
 0x1df   :  { %v376_v48 = vpop.xlane.xlu0 %375 }
 0x1e0   :  { %v379_v49 = vmul.f32 0.03125, %v376_v48  ;;  %v382_v50 = vmul.f32 %v380_v47, %v380_v47 }
 0x1e2   :  { %v381_v51 = vsub.f32 %v370_v41, %v379_v49  ;;  %v384_v52 = vsel %vm187_vm1, %v382_v50, 0.0 }
 0x1e3   :  { %385 = vadd.xlane.f32.xlu1 %v384_v52 }
 0x1e4   :  { %v383_v53 = vmul.f32 %v381_v51, %v381_v51 }
 0x1e6   :  { %v387_v54 = vsel %vm187_vm1, %v383_v53, 0.0 }
 0x1e7   :  { %388 = vadd.xlane.f32.xlu1 %v387_v54 }
 0x270   :  { %v386_v55 = vpop.xlane.xlu1 %385 }
 0x271   :  { %v390_v56 = vmul.f32 0.03125, %v386_v55 }
 0x273   :  { %v392_v57 = vadd.f32 1e-05, %v390_v56 }
 0x274   :  { %v389_v58 = vpop.xlane.xlu1 %388 }
 0x275   :  { %529 = vrsqrt.f32 %v392_v57  ;;  %v391_v59 = vmul.f32 0.03125, %v389_v58 }
 0x277   :  { %v393_v60 = vadd.f32 1e-05, %v391_v59 }
 0x279   :  { %531 = vrsqrt.f32 %v393_v60 }
 0x27f   :  { %v530_v61 = vpop.eup %529 }
 0x280   :  { %v396_v63 = vmul.f32 %v530_v61, %v380_v47 }
 0x282   :  { %v405_v1 = vmul.f32 %v447_v62, %v396_v63 }
 0x283   :  { %v532_v2 = vpop.eup %531 }
 0x284   :  { %v397_v3 = vmul.f32 %v532_v2, %v381_v51  ;;  %v414_v4 = vadd.f32 %v448_v0, %v405_v1 }
 0x286   :  { %v406_v5 = vmul.f32 %v447_v62, %v397_v3  ;;  %416 = vst.msk [vmem:[#allocation10] sm:$0xff] %vm187_vm1, %v414_v4 }
 0x288   :  { %v415_v6 = vadd.f32 %v448_v0, %v406_v5 }
 0x28a   :  { %417 = vst.msk [vmem:[#allocation10 + $0x8] sm:$0xff] %vm187_vm1, %v415_v6 }
 0x28b   :  { %632 = shalt.err (!%p629_p8)
}
 0x28c   :  { %s633_s27 = scalar_lea.hbm %s836_s9, 256 }
 0x28d   :  { %p634_p9 = scmp.ne.s32.totalorder %s836_s9, %s633_s27  ;;  %p637_p10 = scmp.lt.u32.totalorder %s633_s27, %s836_s9 }
 0x28f   :  { %p639_p11 = pnand %p637_p10, %p634_p9 }
 0x291   :  { %642 = shalt.err (!%p639_p11)
}
 0x292   :  { %429 = dma.vmem_to_hbm [thread:$0]  %s424_s0, 256, %s836_s9, [#allocation4], %s653_s21, %s653_s21, %s654_s22  }
 0x293   :  { %649 = dma.done.wait [#allocation4], 256  }
 0x294   :  { %650 = vsyncadd [#allocation4], 4294967040 }
 0x295   :  { %433 = vsyncpa [#allocation3], 1 }
 0x296   :  { %434 = vsyncpa [#allocation6], 1 }
 0x297   :  { %435 = vsyncpa [#allocation9], 1 }
 0x298   :  { %436 = vsyncpa [#allocation4], 1 }

</bundles_post_ra>
